<compile_context>
chip_gen: v7x
topology: tpu7x:2x2x1
jax: 0.10.0
libtpu: 0.0.40
codegen_flags: <defaults>
</compile_context>

<pallas_src>
import jax
import jax.numpy as jnp
from jax.experimental import pallas as pl
from jax.experimental.pallas import tpu as pltpu


DEFAULT_TM = 512      # multiple of 16 (bf16 sublane packing)
DEFAULT_TN = 1024     # multiple of 128 (lanes)
DEFAULT_TK = 1024     # multiple of 128 (lanes); fat K steps amortize per-step cost

_SQRT_HALF = 0.7071067811865476
_SMALL_PATH_BYTES = 8 * 1024 * 1024   # whole-problem-in-VMEM threshold


def _round_up(x, m):
    return (x + m - 1) // m * m


# ----------------------------------------------------------------------------
# Exact-GELU epilogue (erf form, matching torch.nn.GELU's default).
# erf via Abramowitz & Stegun 7.1.26: |error| <= 1.5e-7, only exp/add/mul/select
# so it is guaranteed to lower on the VPU/EUP.
# ----------------------------------------------------------------------------
def _erf_approx(x):
    a1, a2, a3, a4, a5 = (0.254829592, -0.284496736, 1.421413741,
                          -1.453152027, 1.061405429)
    p = 0.3275911
    ax = jnp.abs(x)
    t = 1.0 / (1.0 + p * ax)
    poly = ((((a5 * t + a4) * t + a3) * t + a2) * t + a1) * t
    e = 1.0 - poly * jnp.exp(-ax * ax)
    return jnp.where(x >= 0.0, e, -e)


def _gelu_exact(y):
    return 0.5 * y * (1.0 + _erf_approx(y * _SQRT_HALF))


# ----------------------------------------------------------------------------
# Kernels
# ----------------------------------------------------------------------------
def _linear_gelu_single_kernel(x_ref, w_ref, b_ref, o_ref):
    # Whole problem in one VMEM-resident block: single MXU pass + epilogue.
    acc = jnp.dot(x_ref[...], w_ref[...], preferred_element_type=jnp.float32)
    o_ref[...] = _gelu_exact(acc + b_ref[...])


def _linear_gelu_tiled_kernel(x_ref, w_ref, b_ref, o_ref):
    # x_ref: (tm, tk) bf16   w_ref: (tk, tn) bf16   b_ref: (1, tn) f32
    # o_ref: (tm, tn) f32 — index constant in k, so it is VMEM-resident across
    # the whole K reduction; accumulate directly into it (no scratch needed).
    k = pl.program_id(2)

    @pl.when(k == 0)
    def _():
        o_ref[...] = jnp.zeros_like(o_ref)

    o_ref[...] += jnp.dot(
        x_ref[...], w_ref[...], preferred_element_type=jnp.float32)

    @pl.when(k == pl.num_programs(2) - 1)
    def _():
        # Bias + exact GELU once per output tile, in place, in f32.
        o_ref[...] = _gelu_exact(o_ref[...] + b_ref[...])


# ----------------------------------------------------------------------------
# Wrapper-side helpers
# ----------------------------------------------------------------------------
def pad_weights_for_pallas(w, b, *, tn=DEFAULT_TN, tk=DEFAULT_TK):
    """One-time pad + bf16 cast of the weights (hoisted out of the hot path)."""
    K, N = w.shape
    tk = min(tk, _round_up(K, 128))
    tn = min(tn, _round_up(N, 128))
    K_pad = _round_up(K, tk)
    N_pad = _round_up(N, tn)
    w_p = jnp.zeros((K_pad, N_pad), jnp.bfloat16).at[:K, :N].set(
        w.astype(jnp.bfloat16))
    b_p = jnp.zeros((1, N_pad), jnp.float32).at[0, :N].set(
        b.astype(jnp.float32))
    return w_p, b_p


def _pad_cast_x(x2d, m_pad, k_pad):
    M, K = x2d.shape
    if (M, K) == (m_pad, k_pad):
        return x2d.astype(jnp.bfloat16)          # no pad pass needed
    return jnp.zeros((m_pad, k_pad), jnp.bfloat16).at[:M, :K].set(
        x2d.astype(jnp.bfloat16))


def linear_gelu_pallas(x2d, w_p, b_p, n_out, *,
                       tm=DEFAULT_TM, tn=DEFAULT_TN, tk=DEFAULT_TK):
    """x2d: (M, K) f32, w_p: (K_pad, N_pad) bf16 (pre-padded), b_p: (1, N_pad)
    f32 (pre-padded). Returns (M, n_out) f32 of GELU(x @ w + b)."""
    M, K = x2d.shape
    K_pad, N_pad = w_p.shape
    assert K <= K_pad and n_out <= N_pad

    # ---- grid-free fast path: whole problem as a single VMEM block --------
    M16 = _round_up(M, 16)
    small_bytes = (M16 * K_pad * 2 + K_pad * N_pad * 2 + N_pad * 4
                   + 2 * M16 * N_pad * 4)
    if small_bytes <= _SMALL_PATH_BYTES:
        x_p = _pad_cast_x(x2d, M16, K_pad)
        cost = pl.CostEstimate(
            flops=2 * M16 * K_pad * N_pad,
            transcendentals=M16 * N_pad,
            bytes_accessed=(M16 * K_pad * 2 + K_pad * N_pad * 2
                            + N_pad * 4 + M16 * N_pad * 4))
        out = pl.pallas_call(
            _linear_gelu_single_kernel,
            out_shape=jax.ShapeDtypeStruct((M16, N_pad), jnp.float32),
            cost_estimate=cost,
        )(x_p, w_p, b_p)
        return out[:M, :n_out]

    # ---- tiled path --------------------------------------------------------
    tn = min(tn, N_pad)                 # divides N_pad by construction
    tk = min(tk, K_pad)                 # divides K_pad by construction
    tm = _round_up(min(tm, M16), 16)
    M_pad = _round_up(M, tm)

    # v7x megacore: guarantee >= 2 blocks on a 'parallel' axis so both
    # TensorCores get work when the grid would otherwise be 1 x 1 x K.
    if M_pad == tm and N_pad == tn and tm % 32 == 0:
        tm //= 2

    x_p = _pad_cast_x(x2d, M_pad, K_pad)

    n_m, n_n, n_k = M_pad // tm, N_pad // tn, K_pad // tk
    grid = (n_m, n_n, n_k)

    # Bytes include the x re-read per N tile and w re-read per M tile.
    cost = pl.CostEstimate(
        flops=2 * M_pad * K_pad * N_pad,
        transcendentals=M_pad * N_pad,
        bytes_accessed=(M_pad * K_pad * 2 * n_n
                        + K_pad * N_pad * 2 * n_m
                        + N_pad * 4 * n_m
                        + M_pad * N_pad * 4))

    # Double-buffered working set; keep vmem_limit in sync with the tiles.
    working = (2 * tm * tk * 2 + 2 * tk * tn * 2 + 2 * tn * 4
               + 2 * tm * tn * 4)
    vmem_limit = max(32 * 1024 * 1024, working + 8 * 1024 * 1024)

    out = pl.pallas_call(
        _linear_gelu_tiled_kernel,
        out_shape=jax.ShapeDtypeStruct((M_pad, N_pad), jnp.float32),
        grid_spec=pltpu.PrefetchScalarGridSpec(
            num_scalar_prefetch=0,
            grid=grid,
            in_specs=[
                pl.BlockSpec((tm, tk), lambda i, j, k: (i, k)),
                pl.BlockSpec((tk, tn), lambda i, j, k: (k, j)),
                # Bias index_map constant in k: no redundant bias DMAs.
                pl.BlockSpec((1, tn), lambda i, j, k: (0, j)),
            ],
            out_specs=pl.BlockSpec((tm, tn), lambda i, j, k: (i, j)),
        ),
        compiler_params=pltpu.CompilerParams(
            dimension_semantics=("parallel", "parallel", "arbitrary"),
            vmem_limit_bytes=vmem_limit,
        ),
        cost_estimate=cost,
    )(x_p, w_p, b_p)

    return out[:M, :n_out]


# ----------------------------------------------------------------------------
# Modules
# ----------------------------------------------------------------------------
class InnerLinearGelu:
    """Deterministically-initialized inner module: Linear(H_in, H_out) + GELU."""

    def __init__(self, h_in, h_out, key):
        kw, kb = jax.random.split(key)
        scale = 1.0 / jnp.sqrt(jnp.float32(h_in))
        self.w = jax.random.uniform(kw, (h_in, h_out), jnp.float32, -scale, scale)
        self.b = jax.random.uniform(kb, (h_out,), jnp.float32, -scale, scale)
        # Pad + bf16-cast the weights once (hoisted out of the per-call path).
        self.w_p, self.b_p = pad_weights_for_pallas(self.w, self.b)
        self.h_out = h_out

    def __call__(self, x):
        B, S, H = x.shape
        x2d = x.reshape(B * S, H)                 # glue: reshape in plain JAX
        y2d = linear_gelu_pallas(x2d, self.w_p, self.b_p, self.h_out)
        return y2d.reshape(B, S, self.h_out)


class WrapperFixCheckpointReentrant:
    """JAX/Pallas port of `wrapper_fix_checkpoint_reentrant`."""

    def __init__(self, module):
        self.module = module

    def __call__(self, x, dummy_arg=None):
        # Exact wrapper semantics: require the dummy (grad-enabled) arg, then
        # delegate to the wrapped module.
        assert dummy_arg is not None
        x = self.module(x)
        return x


if __name__ == "__main__":
    key = jax.random.PRNGKey(0)
    kx, kp = jax.random.split(key)

    B, S, H = 2, 8, 32
    x = jax.random.normal(kx, (B, S, H), jnp.float32)
    # TODO(synk): stand-in for torch's requires_grad dummy tensor (no JAX
    # equivalent of the reentrant-checkpoint grad trick).
    dummy = jnp.ones((), jnp.float32)

    inner = InnerLinearGelu(H, H, kp)
    wrapper = WrapperFixCheckpointReentrant(inner)

    out = wrapper(x, dummy_arg=dummy)
    jax.block_until_ready(out)

    # Reference of the inner module with the same bf16 MXU operand rounding
    # and exact (erf) GELU — matches torch.nn.GELU's default.
    xb = x.reshape(B * S, H).astype(jnp.bfloat16).astype(jnp.float32)
    wb = inner.w.astype(jnp.bfloat16).astype(jnp.float32)
    ref2d = jax.nn.gelu(
        jnp.dot(xb, wb, precision=jax.lax.Precision.HIGHEST) + inner.b,
        approximate=False)
    ref = ref2d.reshape(B, S, H)

    assert out.shape == (B, S, H)
    assert jnp.allclose(out, ref, atol=1e-4, rtol=1e-4)

    print("KERNEL_OK")
</pallas_src>

<mosaic_0001>
module attributes {stable_mosaic.version = 11 : i64} {
  func.func @_linear_gelu_single_kernel(%arg0: memref<16x128xbf16, #tpu.memory_space<vmem>>, %arg1: memref<128x128xbf16, #tpu.memory_space<vmem>>, %arg2: memref<1x128xf32, #tpu.memory_space<vmem>>, %arg3: memref<16x128xf32, #tpu.memory_space<vmem>>) attributes {dimension_semantics = [], scalar_prefetch = 0 : i64, scratch_operands = 0 : i64, tpu.core_type = #tpu.core_type<tc>} {
    %c0 = arith.constant 0 : index
    %c0_0 = arith.constant 0 : index
    %0 = vector.load %arg0[%c0, %c0_0] : memref<16x128xbf16, #tpu.memory_space<vmem>>, vector<16x128xbf16>
    %c0_1 = arith.constant 0 : index
    %c0_2 = arith.constant 0 : index
    %1 = vector.load %arg1[%c0_1, %c0_2] : memref<128x128xbf16, #tpu.memory_space<vmem>>, vector<128x128xbf16>
    %cst = arith.constant dense<0.000000e+00> : vector<16x128xf32>
    %2 = tpu.matmul %0, %1, %cst {dimension_numbers = #tpu.dot_dimension_numbers<[1], [0], [0], [1], [0, 0, 1, 1], [], []>} : vector<16x128xbf16>, vector<128x128xbf16>, vector<16x128xf32> -> vector<16x128xf32>
    %c0_3 = arith.constant 0 : index
    %c0_4 = arith.constant 0 : index
    %3 = vector.load %arg2[%c0_3, %c0_4] : memref<1x128xf32, #tpu.memory_space<vmem>>, vector<1x128xf32>
    %4 = vector.broadcast %3 : vector<1x128xf32> to vector<16x128xf32>
    %5 = arith.addf %2, %4 : vector<16x128xf32>
    %cst_5 = arith.constant 5.000000e-01 : f32
    %6 = vector.broadcast %cst_5 : f32 to vector<16x128xf32>
    %7 = arith.mulf %6, %5 : vector<16x128xf32>
    %cst_6 = arith.constant 0.707106769 : f32
    %8 = vector.broadcast %cst_6 : f32 to vector<16x128xf32>
    %9 = arith.mulf %5, %8 : vector<16x128xf32>
    %10 = math.absf %9 : vector<16x128xf32>
    %cst_7 = arith.constant 0.327591091 : f32
    %11 = vector.broadcast %cst_7 : f32 to vector<16x128xf32>
    %12 = arith.mulf %11, %10 : vector<16x128xf32>
    %cst_8 = arith.constant 1.000000e+00 : f32
    %13 = vector.broadcast %cst_8 : f32 to vector<16x128xf32>
    %14 = arith.addf %13, %12 : vector<16x128xf32>
    %cst_9 = arith.constant 1.000000e+00 : f32
    %15 = vector.broadcast %cst_9 : f32 to vector<16x128xf32>
    %16 = arith.divf %15, %14 : vector<16x128xf32>
    %cst_10 = arith.constant 1.06140542 : f32
    %17 = vector.broadcast %cst_10 : f32 to vector<16x128xf32>
    %18 = arith.mulf %17, %16 : vector<16x128xf32>
    %cst_11 = arith.constant -1.45315206 : f32
    %19 = vector.broadcast %cst_11 : f32 to vector<16x128xf32>
    %20 = arith.addf %18, %19 : vector<16x128xf32>
    %21 = arith.mulf %20, %16 : vector<16x128xf32>
    %cst_12 = arith.constant 1.42141378 : f32
    %22 = vector.broadcast %cst_12 : f32 to vector<16x128xf32>
    %23 = arith.addf %21, %22 : vector<16x128xf32>
    %24 = arith.mulf %23, %16 : vector<16x128xf32>
    %cst_13 = arith.constant -0.284496725 : f32
    %25 = vector.broadcast %cst_13 : f32 to vector<16x128xf32>
    %26 = arith.addf %24, %25 : vector<16x128xf32>
    %27 = arith.mulf %26, %16 : vector<16x128xf32>
    %cst_14 = arith.constant 0.254829586 : f32
    %28 = vector.broadcast %cst_14 : f32 to vector<16x128xf32>
    %29 = arith.addf %27, %28 : vector<16x128xf32>
    %30 = arith.mulf %29, %16 : vector<16x128xf32>
    %cst_15 = arith.constant 0.000000e+00 : f32
    %31 = vector.broadcast %cst_15 : f32 to vector<16x128xf32>
    %32 = arith.subf %31, %10 : vector<16x128xf32>
    %33 = arith.mulf %32, %10 : vector<16x128xf32>
    %34 = math.exp %33 : vector<16x128xf32>
    %35 = arith.mulf %30, %34 : vector<16x128xf32>
    %cst_16 = arith.constant 1.000000e+00 : f32
    %36 = vector.broadcast %cst_16 : f32 to vector<16x128xf32>
    %37 = arith.subf %36, %35 : vector<16x128xf32>
    %cst_17 = arith.constant 0.000000e+00 : f32
    %38 = vector.broadcast %cst_17 : f32 to vector<16x128xf32>
    %39 = arith.cmpf oge, %9, %38 : vector<16x128xf32>
    %cst_18 = arith.constant 0.000000e+00 : f32
    %40 = vector.broadcast %cst_18 : f32 to vector<16x128xf32>
    %41 = arith.subf %40, %37 : vector<16x128xf32>
    %42 = arith.select %39, %37, %41 : vector<16x128xi1>, vector<16x128xf32>
    %cst_19 = arith.constant 1.000000e+00 : f32
    %43 = vector.broadcast %cst_19 : f32 to vector<16x128xf32>
    %44 = arith.addf %43, %42 : vector<16x128xf32>
    %45 = arith.mulf %7, %44 : vector<16x128xf32>
    %c0_20 = arith.constant 0 : index
    %c0_21 = arith.constant 0 : index
    %46 = vector.load %arg3[%c0_20, %c0_21] : memref<16x128xf32, #tpu.memory_space<vmem>>, vector<16x128xf32>
    tpu.vector_store %arg3[%c0_20, %c0_21], %45 {strides = array<i32>} : memref<16x128xf32, #tpu.memory_space<vmem>>, vector<16x128xf32>,
    return
  }
}

</mosaic_0001>

<bundles_post_ra>
// kernel: tpu_custom_call.1
= control target key start
LH: loop header
LB: loop body
LE: loop exit
PB: predicated region body
PF: predicated region fallthrough
CT: control target
= control target key end

     0   :  { %8 = vsyncpa [#allocation3], 0  ;;  %s443_s0 = inlined_call_operand.hbm [shape: bf16[16,128], index: 0, kind: input, shape index: {}]   ;;  %s444_s1 = inlined_call_operand.hbm [shape: bf16[128,128], index: 1, kind: input, shape index: {}]   ;;  %s445_s2 = inlined_call_operand.vmem [shape: f32[1,128], index: 2, kind: input, shape index: {}]   ;;  %s446_s3 = inlined_call_operand.hbm [shape: f32[16,128], index: 3, kind: output, shape index: {}]  }
   0x1   :  { %9 = vsyncpa [#allocation6], 0 }
   0x2   :  { %10 = vsyncpa [#allocation4], 0  ;;  %s375_s12 = smov [#allocation2]   ;;  %s303_s16 = scalar_lea.hbm %s443_s0, 128 }
   0x3   :  { %s16_s13 = sshll.u32 %s375_s12, 4  ;;  %p304_p0 = scmp.ne.s32.totalorder %s443_s0, %s303_s16  ;;  %s17_s13 = int_to_ptr.vmem [resolvable:$true] %s16_s13 }
   0x4   :  { %p307_p1 = scmp.lt.u32.totalorder %s303_s16, %s443_s0 }
   0x6   :  { %p309_p2 = pnand %p307_p1, %p304_p0 }
   0x8   :  { %312 = shalt.err (!%p309_p2)
}
   0x9   :  { %s313_s21 = scalar_lea.vmem %s17_s13, 128  ;;  %p318_p4 = scmp.lt.s32.totalorder %s17_s13, %s17_s13 }
   0xa   :  { %p314_p3 = scmp.ne.s32.totalorder %s17_s13, %s313_s21  ;;  %p319_p5 = scmp.lt.s32.totalorder %s313_s21, %s313_s21 }
   0xc   :  { %p320_p6 = por %p319_p5, %p318_p4 }
   0xe   :  { %p321_p7 = pnand %p320_p6, %p314_p3 }
  0x10   :  { %324 = shalt.err (!%p321_p7)
}
  0x11   :  { %s376_s22 = smov 64   ;;  %s377_s23 = smov 4  }
  0x12   :  { %22 = dma.hbm_to_vmem [thread:$0]  %s443_s0, 128, %s17_s13, [#allocation3], %s376_s22, %s376_s22, %s377_s23  }
  0x13   :  { %s378_s26 = smov [#allocation5]   ;;  %s325_s30 = scalar_lea.hbm %s444_s1, 1024 }
  0x14   :  { %s28_s27 = sshll.u32 %s378_s26, 4  ;;  %p326_p8 = scmp.ne.s32.totalorder %s444_s1, %s325_s30  ;;  %s29_s27 = int_to_ptr.vmem [resolvable:$true] %s28_s27 }
  0x15   :  { %p329_p9 = scmp.lt.u32.totalorder %s325_s30, %s444_s1 }
  0x17   :  { %p331_p10 = pnand %p329_p9, %p326_p8 }
  0x19   :  { %334 = shalt.err (!%p331_p10)
}
  0x1a   :  { %s335_s8 = scalar_lea.vmem %s29_s27, 1024  ;;  %p340_p12 = scmp.lt.s32.totalorder %s29_s27, %s29_s27 }
  0x1b   :  { %p336_p11 = scmp.ne.s32.totalorder %s29_s27, %s335_s8  ;;  %p341_p13 = scmp.lt.s32.totalorder %s335_s8, %s335_s8 }
  0x1d   :  { %p342_p0 = por %p341_p13, %p340_p12 }
  0x1f   :  { %p343_p1 = pnand %p342_p0, %p336_p11 }
  0x21   :  { %346 = shalt.err (!%p343_p1)
}
  0x22   :  { %34 = dma.hbm_to_vmem [thread:$0]  %s444_s1, 1024, %s29_s27, [#allocation6], %s376_s22, %s376_s22, %s377_s23  }
  0x23   :  { %369 = dma.done.wait [#allocation3], 128  }
  0x24   :  { %370 = vsyncadd [#allocation3], 4294967168 }
  0x25   :  { %371 = dma.done.wait [#allocation6], 1024  }
  0x26   :  { %372 = vsyncadd [#allocation6], 4294966272  ;;  %v379_v0 = vmov 0.0   ;;  %vm380_vm0 = vmmov 0   ;;  %v286_v1 = vld [vmem:[#allocation5] sm:$0xff]   ;;  %v287_v2 = vld [vmem:[#allocation5 + $0x8] sm:$0xff]  }
  0x27   :  { %257 = vmatprep.subr.bf16.mxu0 %v379_v0  ;;  %273 = vmatprep.mubr.msk.bf16.mxu0 %vm380_vm0, %v379_v0  ;;  %v288_v3 = vld [vmem:[#allocation5 + $0x10] sm:$0xff]   ;;  %v289_v4 = vld [vmem:[#allocation5 + $0x18] sm:$0xff]   ;;  %v290_v5 = vld [vmem:[#allocation5 + $0x20] sm:$0xff]  }
  0x28   :  { %258 = vmatpush3.bf16.msra.mxu0 %v286_v1  ;;  %v291_v6 = vld [vmem:[#allocation5 + $0x28] sm:$0xff]   ;;  %v292_v7 = vld [vmem:[#allocation5 + $0x30] sm:$0xff]   ;;  %v293_v8 = vld [vmem:[#allocation5 + $0x38] sm:$0xff]  }
  0x29   :  { %259 = vmatprep.subr.bf16.mxu0 %v379_v0  ;;  %v294_v9 = vld [vmem:[#allocation2] sm:$0xff]  }
  0x2a   :  { %v238_v10 = vld [vmem:[%s445_s2] ss:$0 sm:$0xff]  ;;  %s381_s2 = smov [#allocation7]  }
  0x2b   :  { %s225_s11 = sshll.u32 %s381_s2, 4  ;;  %s226_s11 = int_to_ptr.vmem [resolvable:$true] %s225_s11 }
  0x2c   :  { %260 = vmatpush3.bf16.msra.mxu0 %v287_v2  ;;  %s347_s12 = scalar_lea.vmem %s226_s11, 256  ;;  %p352_p3 = scmp.lt.s32.totalorder %s226_s11, %s226_s11 }
  0x2d   :  { %261 = vmatprep.subr.bf16.mxu0 %v379_v0  ;;  %p348_p2 = scmp.ne.s32.totalorder %s226_s11, %s347_s12  ;;  %p353_p4 = scmp.lt.s32.totalorder %s347_s12, %s347_s12 }
  0x2f   :  { %p354_p5 = por %p353_p4, %p352_p3 }
  0x30   :  { %262 = vmatpush3.bf16.msra.mxu0 %v288_v3 }
  0x31   :  { %263 = vmatprep.subr.bf16.mxu0 %v379_v0  ;;  %p355_p6 = pnand %p354_p5, %p348_p2 }
  0x34   :  { %264 = vmatpush3.bf16.msra.mxu0 %v289_v4 }
  0x35   :  { %265 = vmatprep.subr.bf16.mxu0 %v379_v0 }
  0x38   :  { %266 = vmatpush3.bf16.msra.mxu0 %v290_v5 }
  0x39   :  { %267 = vmatprep.subr.bf16.mxu0 %v379_v0 }
  0x3c   :  { %268 = vmatpush3.bf16.msra.mxu0 %v291_v6 }
  0x3d   :  { %269 = vmatprep.subr.bf16.mxu0 %v379_v0 }
  0x40   :  { %270 = vmatpush3.bf16.msra.mxu0 %v292_v7 }
  0x41   :  { %271 = vmatprep.subr.bf16.mxu0 %v379_v0 }
  0x44   :  { %272 = vmatpush3.bf16.msra.mxu0 %v293_v8 }
  0x47   :  { %274 = vmatmul.mubr.bf16.vlgmr.msra.gmra.mrb[0].mxu0 %v294_v9 }
 0x11a   :  { %v157_v11 = vpop.f32.mrb[0].mxu0 }
 0x11b   :  { %v158_v12 = vadd.f32 %v238_v10, %v157_v11  ;;  %v275_v13 = vpop.f32.mrb[1].mxu0 }
 0x11c   :  { %v160_v14 = vpop.f32.mrb[2].mxu0 }
 0x11d   :  { %v166_v15 = vmul.f32 0.70710677, %v158_v12  ;;  %v161_v16 = vadd.f32 %v238_v10, %v160_v14  ;;  %v276_v17 = vpop.f32.mrb[3].mxu0  ;;  %v164_v59 = vmul.f32 0.5, %v158_v12 }
 0x11f   :  { %v168_v18 = vand.u32 2147483647, %v166_v15  ;;  %v167_v19 = vmul.f32 0.70710677, %v161_v16  ;;  %vm208_vm1 = vcmp.ge.f32.partialorder %v166_v15, 0.0  ;;  %v165_v0 = vmul.f32 0.5, %v161_v16 }
 0x121   :  { %v170_v20 = vmul.f32 0.3275911, %v168_v18  ;;  %v169_v21 = vand.u32 2147483647, %v167_v19  ;;  %v196_v25 = vsub.f32 0.0, %v168_v18  ;;  %vm209_vm2 = vcmp.ge.f32.partialorder %v167_v19, 0.0 }
 0x123   :  { %v172_v22 = vadd.f32 1.0, %v170_v20  ;;  %v171_v23 = vmul.f32 0.3275911, %v169_v21  ;;  %v197_v26 = vsub.f32 0.0, %v169_v21  ;;  %v198_v28 = vmul.f32 %v196_v25, %v168_v18 }
 0x125   :  { %295 = vrcp.f32 %v172_v22  ;;  %v173_v24 = vadd.f32 1.0, %v171_v23  ;;  %v199_v32 = vmul.f32 %v197_v26, %v169_v21  ;;  %v200_v33 = vmul.f32 1.442695, %v198_v28 }
 0x127   :  { %297 = vrcp.f32 %v173_v24  ;;  %v202_v38 = vmul.f32 1.442695, %v199_v32 }
 0x128   :  { %299 = vpow2.f32 %v200_v33 }
 0x129   :  { %301 = vpow2.f32 %v202_v38 }
 0x12f   :  { %v296_v27 = vpop.eup %295 }
 0x130   :  { %v178_v29 = vmul.f32 1.0614054, %v296_v27 }
 0x131   :  { %v298_v30 = vpop.eup %297 }
 0x132   :  { %v180_v31 = vadd.f32 -1.4531521, %v178_v29  ;;  %v179_v34 = vmul.f32 1.0614054, %v298_v30  ;;  %v300_v49 = vpop.eup %299 }
 0x133   :  { %v302_v53 = vpop.eup %301 }
 0x134   :  { %v182_v35 = vmul.f32 %v296_v27, %v180_v31  ;;  %v181_v36 = vadd.f32 -1.4531521, %v179_v34 }
 0x136   :  { %v184_v37 = vadd.f32 1.4214138, %v182_v35  ;;  %v183_v39 = vmul.f32 %v298_v30, %v181_v36 }
 0x138   :  { %v186_v40 = vmul.f32 %v296_v27, %v184_v37  ;;  %v185_v41 = vadd.f32 1.4214138, %v183_v39 }
 0x13a   :  { %v188_v42 = vadd.f32 -0.28449672, %v186_v40  ;;  %v187_v43 = vmul.f32 %v298_v30, %v185_v41 }
 0x13c   :  { %v190_v44 = vmul.f32 %v296_v27, %v188_v42  ;;  %v189_v45 = vadd.f32 -0.28449672, %v187_v43 }
 0x13e   :  { %v192_v46 = vadd.f32 0.2548296, %v190_v44  ;;  %v191_v47 = vmul.f32 %v298_v30, %v189_v45 }
 0x140   :  { %v194_v48 = vmul.f32 %v296_v27, %v192_v46  ;;  %v193_v50 = vadd.f32 0.2548296, %v191_v47 }
 0x142   :  { %v204_v51 = vmul.f32 %v300_v49, %v194_v48  ;;  %v195_v52 = vmul.f32 %v298_v30, %v193_v50 }
 0x144   :  { %v206_v54 = vsub.f32 1.0, %v204_v51  ;;  %v205_v55 = vmul.f32 %v302_v53, %v195_v52 }
 0x146   :  { %v210_v56 = vsub.f32 0.0, %v206_v54  ;;  %v207_v57 = vsub.f32 1.0, %v205_v55 }
 0x148   :  { %v212_v58 = vsel %vm208_vm1, %v206_v54, %v210_v56  ;;  %v211_v61 = vsub.f32 0.0, %v207_v57 }
 0x149   :  { %v214_v60 = vadd.f32 1.0, %v212_v58 }
 0x14a   :  { %v213_v63 = vsel %vm209_vm2, %v207_v57, %v211_v61 }
 0x14b   :  { %v216_v62 = vmul.f32 %v214_v60, %v164_v59  ;;  %v215_v1 = vadd.f32 1.0, %v213_v63 }
 0x14d   :  { %218 = vst [vmem:[#allocation7] sm:$0xff] %v216_v62  ;;  %v217_v2 = vmul.f32 %v215_v1, %v165_v0 }
 0x14f   :  { %219 = vst [vmem:[#allocation7 + $0x8] sm:$0xff] %v217_v2 }
 0x150   :  { %358 = shalt.err (!%p355_p6)
}
 0x151   :  { %s359_s15 = scalar_lea.hbm %s446_s3, 256 }
 0x152   :  { %p360_p7 = scmp.ne.s32.totalorder %s446_s3, %s359_s15  ;;  %p363_p8 = scmp.lt.u32.totalorder %s359_s15, %s446_s3 }
 0x154   :  { %p365_p9 = pnand %p363_p8, %p360_p7 }
 0x156   :  { %368 = shalt.err (!%p365_p9)
}
 0x157   :  { %s382_s20 = smov 128   ;;  %s383_s21 = smov 8  }
 0x158   :  { %231 = dma.vmem_to_hbm [thread:$0]  %s226_s11, 256, %s446_s3, [#allocation4], %s382_s20, %s382_s20, %s383_s21  }
 0x159   :  { %373 = dma.done.wait [#allocation4], 256  }
 0x15a   :  { %374 = vsyncadd [#allocation4], 4294967040 }
 0x15b   :  { %235 = vsyncpa [#allocation3], 1 }
 0x15c   :  { %236 = vsyncpa [#allocation6], 1 }
 0x15d   :  { %237 = vsyncpa [#allocation4], 1 }

</bundles_post_ra>
